<compile_context>
chip_gen: v6e
topology: v6e:2x2x1
jax: 0.10.0
libtpu: 0.0.40
codegen_flags: <defaults>
</compile_context>

<pallas_src>
import functools
import math

import numpy as np

import jax
import jax.numpy as jnp
from jax import lax
from jax.experimental import pallas as pl
from jax.experimental.pallas import tpu as pltpu

ANCHOR_SCALE = (128.0, 256.0, 512.0)
ANCHOR_ASPECT_RATIO = (0.5, 1.0, 2.0)
DOWNSAMPLE = 16


def generate_base_anchors(anchor_scale, anchor_aspect_ratio):
    """Same math as AnchorGenerator.generate_base_anchors (setup glue, numpy)."""
    scale = np.asarray(anchor_scale, np.float32)
    ratio = np.asarray(anchor_aspect_ratio, np.float32)
    h_ratio = np.sqrt(ratio)
    w_ratio = 1.0 / h_ratio
    ws = (w_ratio[:, None] * scale[None, :]).reshape(-1)   # ratio-major, scale-minor
    hs = (h_ratio[:, None] * scale[None, :]).reshape(-1)
    base = np.stack([-ws, -hs, ws, hs], axis=1) / 2.0      # (A, 4)
    return base.astype(np.float32)


def _anchor_kernel(c0_ref, c1_ref, out_ref, *, tile_r):
    """out[r, :] = c0 + c1 * global_row_index  (single broadcast mul-add).

    c0_ref, c1_ref : (1, L) f32 compile-time-derived constants (L % 128 == 0)
    out_ref        : (tile_r, L) f32 block at row offset program_id(0)*tile_r
    """
    r0 = pl.program_id(0) * tile_r
    row = (lax.broadcasted_iota(jnp.int32, (tile_r, 1), 0) + r0).astype(jnp.float32)
    out_ref[...] = c0_ref[...] + c1_ref[...] * row


def anchor_generator_forward(features,
                             anchor_scale=ANCHOR_SCALE,
                             anchor_aspect_ratio=ANCHOR_ASPECT_RATIO,
                             downsample=DOWNSAMPLE):
    """Pallas implementation of AnchorGenerator.forward.

    features: list of NCHW arrays (all with identical H, W -- torch.stack in
              the reference requires this).
    Returns:  (num_features, H*W*A, 4) float32 anchors.
    """
    base = generate_base_anchors(anchor_scale, anchor_aspect_ratio)   # (A, 4) numpy
    num_anchors = base.shape[0]
    a4 = num_anchors * 4

    sizes = [tuple(int(s) for s in f.shape[-2:]) for f in features]
    f_h, f_w = sizes[0]
    assert all(s == (f_h, f_w) for s in sizes), "all features must share spatial size"
    n_feats = len(features)
    hw = f_h * f_w

    # ---- lane-dense packing: k image-rows per output row, L % 128 == 0 ----
    k = 128 // math.gcd(f_w * a4, 128)
    L = k * f_w * a4
    rows_needed = -(-f_h // k)

    # ---- compile-time per-column constants: value(R, j) = c0[j] + c1[j] * R ----
    # flat order of column j inside a row-group: (sub-row, grid-x, anchor, coord)
    j = np.arange(L)
    subrow = j // (f_w * a4)                 # which image row within the group
    rem = j % (f_w * a4)
    gx = rem // a4                           # grid-x index
    m = rem % a4                             # anchor*4 + coord
    base_flat = base.reshape(-1)
    is_y = (m % 2 == 1).astype(np.float32)   # coords are [x1, y1, x2, y2]
    ds = float(downsample)
    c0 = base_flat[m] + (1.0 - is_y) * gx * ds + is_y * subrow * ds
    c1 = is_y * (k * ds)
    c0 = jnp.asarray(c0.astype(np.float32)[None, :])      # (1, L)
    c1 = jnp.asarray(c1.astype(np.float32)[None, :])      # (1, L)

    # ---- row tiling: multiple-of-8 tiles, ~<=2 MiB per output block ----
    tile_r = 8
    max_block_bytes = 2 * 1024 * 1024
    while tile_r * 2 <= rows_needed and (tile_r * 2) * L * 4 <= max_block_bytes:
        tile_r *= 2
    if rows_needed <= tile_r:
        tile_r = rows_needed                 # single full-dim block
        rows_padded = rows_needed
    else:
        rows_padded = -(-rows_needed // tile_r) * tile_r
    grid = (rows_padded // tile_r,)

    kernel = functools.partial(_anchor_kernel, tile_r=tile_r)

    out = pl.pallas_call(
        kernel,
        out_shape=jax.ShapeDtypeStruct((rows_padded, L), jnp.float32),
        grid_spec=pltpu.PrefetchScalarGridSpec(
            num_scalar_prefetch=0,
            grid=grid,
            in_specs=[pl.BlockSpec((1, L), lambda i: (0, 0)),
                      pl.BlockSpec((1, L), lambda i: (0, 0))],
            out_specs=pl.BlockSpec((tile_r, L), lambda i: (i, 0)),
        ),
        compiler_params=pltpu.CompilerParams(dimension_semantics=("parallel",)),
    )(c0, c1)

    # Row-major flatten of (rows, L) is exactly the (cell, anchor, coord) flat
    # order of the reference; slice off any row padding, then reshape.
    flat = out.reshape(-1)[: hw * a4]
    anchors_one = flat.reshape(hw * num_anchors, 4)
    return jnp.broadcast_to(anchors_one[None, :, :], (n_feats, hw * num_anchors, 4))


def _reference_forward(features, downsample=DOWNSAMPLE):
    """Pure-JAX reference mirroring the PyTorch code (for verification)."""
    base = jnp.asarray(generate_base_anchors(ANCHOR_SCALE, ANCHOR_ASPECT_RATIO))
    outs = []
    for f in features:
        f_h, f_w = f.shape[-2:]
        gy, gx = jnp.meshgrid(jnp.arange(f_h) * downsample,
                              jnp.arange(f_w) * downsample, indexing="ij")
        gy, gx = gy.reshape(-1), gx.reshape(-1)
        gxy = jnp.stack([gx, gy, gx, gy], axis=1).astype(jnp.float32)
        outs.append((gxy[:, None, :] + base[None, :, :]).reshape(-1, 4))
    return jnp.stack(outs, axis=0)


if __name__ == "__main__":
    key = jax.random.PRNGKey(0)
    k1, k2 = jax.random.split(key)
    # Two small NCHW feature maps: batch=2, channels=4, spatial=16x16.
    features = [
        jax.random.normal(k1, (2, 4, 16, 16), dtype=jnp.float32),
        jax.random.normal(k2, (2, 4, 16, 16), dtype=jnp.float32),
    ]

    anchors = anchor_generator_forward(features)
    anchors = jax.block_until_ready(anchors)

    expected = _reference_forward(features)
    assert anchors.shape == (2, 16 * 16 * 9, 4), anchors.shape
    assert anchors.dtype == jnp.float32
    assert jnp.allclose(anchors, expected, rtol=1e-5, atol=1e-3), "mismatch vs reference"

    print("KERNEL_OK")
</pallas_src>

<mosaic_0001>
module attributes {stable_mosaic.version = 11 : i64} {
  func.func @_anchor_kernel(%arg0: i32, %arg1: memref<1x1152xf32, #tpu.memory_space<vmem>>, %arg2: memref<1x1152xf32, #tpu.memory_space<vmem>>, %arg3: memref<8x1152xf32, #tpu.memory_space<vmem>>) attributes {dimension_semantics = [#tpu.dimension_semantics<parallel>], iteration_bounds = array<i64: 1>, scalar_prefetch = 0 : i64, scratch_operands = 0 : i64, tpu.core_type = #tpu.core_type<tc>, window_params = [{pipeline_mode = #tpu.pipeline_mode<synchronous>, transform_indices = @transform_0, window_bounds = array<i64: 1, 1152>}, {pipeline_mode = #tpu.pipeline_mode<synchronous>, transform_indices = @transform_1, window_bounds = array<i64: 1, 1152>}, {transform_indices = @transform_2, window_bounds = array<i64: 8, 1152>}]} {
    %c8_i32 = arith.constant 8 : i32
    %0 = arith.muli %arg0, %c8_i32 : i32
    %1 = tpu.iota {dimensions = array<i32: 0>} : vector<8x1xi32>
    %2 = vector.broadcast %0 : i32 to vector<8x1xi32>
    %3 = arith.addi %1, %2 : vector<8x1xi32>
    %4 = arith.sitofp %3 : vector<8x1xi32> to vector<8x1xf32>
    %c0 = arith.constant 0 : index
    %c0_0 = arith.constant 0 : index
    %5 = vector.load %arg1[%c0, %c0_0] : memref<1x1152xf32, #tpu.memory_space<vmem>>, vector<1x1152xf32>
    %c0_1 = arith.constant 0 : index
    %c0_2 = arith.constant 0 : index
    %6 = vector.load %arg2[%c0_1, %c0_2] : memref<1x1152xf32, #tpu.memory_space<vmem>>, vector<1x1152xf32>
    %7 = vector.broadcast %6 : vector<1x1152xf32> to vector<8x1152xf32>
    %8 = vector.broadcast %4 : vector<8x1xf32> to vector<8x1152xf32>
    %9 = arith.mulf %7, %8 : vector<8x1152xf32>
    %10 = vector.broadcast %5 : vector<1x1152xf32> to vector<8x1152xf32>
    %11 = arith.addf %10, %9 : vector<8x1152xf32>
    %c0_3 = arith.constant 0 : index
    %c0_4 = arith.constant 0 : index
    %12 = vector.load %arg3[%c0_3, %c0_4] : memref<8x1152xf32, #tpu.memory_space<vmem>>, vector<8x1152xf32>
    tpu.vector_store %arg3[%c0_3, %c0_4], %11 {strides = array<i32>} : memref<8x1152xf32, #tpu.memory_space<vmem>>, vector<8x1152xf32>,
    return
  }
  func.func @transform_0(%arg0: i32) -> (i32, i32) {
    %c0_i32 = arith.constant 0 : i32
    %c0_i32_0 = arith.constant 0 : i32
    %c0_i32_1 = arith.constant 0 : i32
    return %c0_i32, %c0_i32_0 : i32, i32
  }
  func.func @transform_1(%arg0: i32) -> (i32, i32) {
    %c0_i32 = arith.constant 0 : i32
    %c0_i32_0 = arith.constant 0 : i32
    %c0_i32_1 = arith.constant 0 : i32
    return %c0_i32, %c0_i32_0 : i32, i32
  }
  func.func @transform_2(%arg0: i32) -> (i32, i32) {
    %c0_i32 = arith.constant 0 : i32
    %c0_i32_0 = arith.constant 0 : i32
    return %arg0, %c0_i32 : i32, i32
  }
}

</mosaic_0001>

<bundles_post_ra>
// kernel: tpu_custom_call.1
= control target key start
LH: loop header
LB: loop body
LE: loop exit
PB: predicated region body
PF: predicated region fallthrough
CT: control target
= control target key end

     0   :  { %7 = vsyncpa [#allocation3], 0  ;;  %s281_s0 = inlined_call_operand.hbm [shape: f32[1,1152], index: 0, kind: input, shape index: {}]   ;;  %s282_s1 = inlined_call_operand.hbm [shape: f32[1,1152], index: 1, kind: input, shape index: {}]   ;;  %s283_s2 = inlined_call_operand.hbm [shape: f32[8,1152], index: 2, kind: output, shape index: {}]  }
   0x1   :  { %8 = vsyncpa [#allocation6], 0 }
   0x2   :  { %9 = vsyncpa [#allocation4], 0  ;;  %s254_s9 = smov [#allocation2]   ;;  %s255_s11 = smov [#allocation5]  }
   0x3   :  { %s16_s10 = sshll.u32 %s254_s9, 4  ;;  %s26_s12 = sshll.u32 %s255_s11, 4  ;;  %s17_s10 = int_to_ptr.vmem [resolvable:$true] %s16_s10  ;;  %s27_s12 = int_to_ptr.vmem [resolvable:$true] %s26_s12 }
   0x4   :  { %s196_s13 = scalar_lea.vmem %s17_s10, 144  ;;  %s200_s14 = scalar_lea.vmem %s17_s10, 160 }
   0x5   :  { %p197_p0 = scmp.ne.s32.totalorder %s17_s10, %s196_s13  ;;  %p201_p1 = scmp.lt.s32.totalorder %s17_s10, %s17_s10 }
   0x6   :  { %p202_p2 = scmp.lt.s32.totalorder %s200_s14, %s196_s13 }
   0x8   :  { %p203_p3 = por %p202_p2, %p201_p1 }
   0xa   :  { %p204_p4 = pnand %p203_p3, %p197_p0 }
   0xc   :  { %207 = shalt.err (!%p204_p4)
}
   0xd   :  { %19 = dma.hbm_to_vmem [thread:$0]  %s281_s0, 144, %s17_s10, [#allocation3]  }
   0xe   :  { %s216_s17 = scalar_lea.vmem %s27_s12, 144  ;;  %s220_s18 = scalar_lea.vmem %s27_s12, 160 }
   0xf   :  { %p217_p5 = scmp.ne.s32.totalorder %s27_s12, %s216_s17  ;;  %p221_p6 = scmp.lt.s32.totalorder %s27_s12, %s27_s12 }
  0x10   :  { %p222_p7 = scmp.lt.s32.totalorder %s220_s18, %s216_s17 }
  0x12   :  { %p223_p8 = por %p222_p7, %p221_p6 }
  0x14   :  { %p224_p9 = pnand %p223_p8, %p217_p5 }
  0x16   :  { %227 = shalt.err (!%p224_p9)
}
  0x17   :  { %29 = dma.hbm_to_vmem [thread:$0]  %s282_s1, 144, %s27_s12, [#allocation6]  }
  0x18   :  { %248 = dma.done.wait [#allocation3], 144  }
  0x19   :  { %249 = vsyncadd [#allocation3], 4294967152 }
  0x1a   :  { %250 = dma.done.wait [#allocation6], 144  }
  0x1b   :  { %251 = vsyncadd [#allocation6], 4294967152  ;;  %v37_v0 = vlaneseq  ;;  %v42_v8 = vld [vmem:[#allocation2] sm:$0xff]  ;;  %v44_v9 = vld [vmem:[#allocation5] sm:$0xff]  ;;  %s256_s0 = smov [#allocation7]  }
  0x1c   :  { %v183_v33 = vld [vmem:[#allocation5 + $0x8] ss:$0 sm:$0xff]  ;;  %v184_v42 = vld [vmem:[#allocation2 + $0x8] ss:$0 sm:$0xff]  ;;  %s173_s1 = sshll.u32 %s256_s0, 4  ;;  %s174_s1 = int_to_ptr.vmem [resolvable:$true] %s173_s1 }
  0x1d   :  { %v38_v1 = vshrl.u32 %v37_v0, 7  ;;  %s228_s21 = scalar_lea.vmem %s174_s1, 1152  ;;  %p233_p11 = scmp.lt.s32.totalorder %s174_s1, %s174_s1 }
  0x1e   :  { %p229_p10 = scmp.ne.s32.totalorder %s174_s1, %s228_s21  ;;  %p234_p12 = scmp.lt.s32.totalorder %s228_s21, %s228_s21 }
  0x1f   :  { %v50_v2 = vsub.s32 0, %v38_v1  ;;  %v54_v3 = vsub.s32 1, %v38_v1  ;;  %v58_v4 = vsub.s32 2, %v38_v1  ;;  %v62_v5 = vsub.s32 3, %v38_v1 }
  0x20   :  { %v41_v6 = vcvt.s32.f32 %v38_v1  ;;  %v66_v7 = vsub.s32 4, %v38_v1  ;;  %v70_v10 = vsub.s32 5, %v38_v1  ;;  %v74_v11 = vsub.s32 6, %v38_v1  ;;  %p235_p13 = por %p234_p12, %p233_p11 }
  0x21   :  { %v78_v12 = vsub.s32 7, %v38_v1  ;;  %v51_v13 = vrot.slane %v44_v9, %v50_v2  ;;  %v107_v14 = vrot.slane %v42_v8, %v50_v2  ;;  %v55_v15 = vrot.slane %v44_v9, %v54_v3 }
  0x22   :  { %v111_v16 = vrot.slane %v42_v8, %v54_v3  ;;  %v59_v17 = vrot.slane %v44_v9, %v58_v4  ;;  %v115_v18 = vrot.slane %v42_v8, %v58_v4  ;;  %v63_v19 = vrot.slane %v44_v9, %v62_v5  ;;  %p236_p0 = pnand %p235_p13, %p229_p10 }
  0x23   :  { %v119_v20 = vrot.slane %v42_v8, %v62_v5  ;;  %v93_v21 = vmul.f32 %v51_v13, %v41_v6  ;;  %v94_v22 = vmul.f32 %v55_v15, %v41_v6  ;;  %v67_v23 = vrot.slane %v44_v9, %v66_v7 }
  0x24   :  { %v123_v24 = vrot.slane %v42_v8, %v66_v7  ;;  %v95_v25 = vmul.f32 %v59_v17, %v41_v6  ;;  %v96_v26 = vmul.f32 %v63_v19, %v41_v6  ;;  %v71_v27 = vrot.slane %v44_v9, %v70_v10 }
  0x25   :  { %v127_v28 = vrot.slane %v42_v8, %v70_v10  ;;  %v149_v29 = vadd.f32 %v107_v14, %v93_v21  ;;  %v150_v30 = vadd.f32 %v111_v16, %v94_v22  ;;  %v97_v31 = vmul.f32 %v67_v23, %v41_v6 }
  0x26   :  { %v75_v32 = vrot.slane %v44_v9, %v74_v11  ;;  %v151_v34 = vadd.f32 %v115_v18, %v95_v25  ;;  %v152_v35 = vadd.f32 %v119_v20, %v96_v26  ;;  %v98_v36 = vmul.f32 %v71_v27, %v41_v6 }
  0x27   :  { %v131_v37 = vrot.slane %v42_v8, %v74_v11  ;;  %158 = vst [vmem:[#allocation7] sm:$0xff] %v149_v29  ;;  %159 = vst [vmem:[#allocation7 + $0x8] sm:$0xff] %v150_v30  ;;  %v153_v38 = vadd.f32 %v123_v24, %v97_v31  ;;  %v79_v40 = vrot.slane %v44_v9, %v78_v12 }
  0x28   :  { %v99_v39 = vmul.f32 %v75_v32, %v41_v6  ;;  %v135_v41 = vrot.slane %v42_v8, %v78_v12  ;;  %160 = vst [vmem:[#allocation7 + $0x10] sm:$0xff] %v151_v34  ;;  %161 = vst [vmem:[#allocation7 + $0x18] sm:$0xff] %v152_v35  ;;  %v154_v43 = vadd.f32 %v127_v28, %v98_v36 }
  0x29   :  { %v101_v44 = vmul.f32 %v183_v33, %v41_v6  ;;  %162 = vst [vmem:[#allocation7 + $0x20] sm:$0xff] %v153_v38  ;;  %v100_v46 = vmul.f32 %v79_v40, %v41_v6 }
  0x2a   :  { %v155_v45 = vadd.f32 %v131_v37, %v99_v39  ;;  %163 = vst [vmem:[#allocation7 + $0x28] sm:$0xff] %v154_v43 }
  0x2b   :  { %v157_v47 = vadd.f32 %v184_v42, %v101_v44  ;;  %v156_v48 = vadd.f32 %v135_v41, %v100_v46 }
  0x2c   :  { %164 = vst [vmem:[#allocation7 + $0x30] sm:$0xff] %v155_v45 }
  0x2d   :  { %166 = vst [vmem:[#allocation7 + $0x40] sm:$0xff] %v157_v47  ;;  %165 = vst [vmem:[#allocation7 + $0x38] sm:$0xff] %v156_v48 }
  0x2e   :  { %239 = shalt.err (!%p236_p0)
}
  0x2f   :  { %176 = dma.vmem_to_hbm [thread:$0]  %s174_s1, 1152, %s283_s2, [#allocation4]  }
  0x30   :  { %252 = dma.done.wait [#allocation4], 1152  }
  0x31   :  { %253 = vsyncadd [#allocation4], 4294966144 }
  0x32   :  { %180 = vsyncpa [#allocation3], 1 }
  0x33   :  { %181 = vsyncpa [#allocation6], 1 }
  0x34   :  { %182 = vsyncpa [#allocation4], 1 }

</bundles_post_ra>
